<compile_context>
chip_gen: v6e
topology: v6e:2x2x1
jax: 0.10.0
libtpu: 0.0.40
codegen_flags: <defaults>
</compile_context>

<pallas_src>
import functools
import math

import jax
import jax.numpy as jnp
from jax import lax
from jax.experimental import pallas as pl
from jax.experimental.pallas import tpu as pltpu


# -----------------------------------------------------------------------------
# One-time, cached pltpu.roll rotation-sign resolution.
# The hot kernel always uses pltpu.roll (XLU); the probe only pins the sign so a
# convention difference can never silently flip the depthwise-conv taps.
# -----------------------------------------------------------------------------
_ROLL_SIGN = None


def _lane_roll_sign():
    """Return s such that pltpu.roll(a, s*k, axis=-1) == jnp.roll(a, k, axis=-1)."""
    global _ROLL_SIGN
    if _ROLL_SIGN is None:
        def _probe(x_ref, o_ref):
            o_ref[...] = pltpu.roll(x_ref[...], 1, 1)

        x = jnp.tile(jnp.arange(128, dtype=jnp.float32)[None, :], (8, 1))
        y = pl.pallas_call(
            _probe, out_shape=jax.ShapeDtypeStruct((8, 128), jnp.float32))(x)
        v = float(y[0, 0])
        if v == 127.0:        # pltpu.roll(x, s) == jnp.roll(x, s)
            _ROLL_SIGN = 1
        elif v == 1.0:        # opposite rotation convention
            _ROLL_SIGN = -1
        else:
            raise RuntimeError(f"unexpected pltpu.roll convention (probe value {v})")
    return _ROLL_SIGN


# -----------------------------------------------------------------------------
# Kernel: one grid step == one image (block lane width = H*W).
# -----------------------------------------------------------------------------
def inverted_residual_kernel(
    xT_ref,                    # (Cin,  HW)   f32   input slice (channels-major)
    wpwT_ref,                  # (Cmid, Cin)  bf16  1x1 expand weight^T
    s1_ref, b1_ref,            # (Cmid, 1)    f32   folded BN1
    wdw_ref,                   # (Cmid, 9)    f32   3x3 dw weight, col k = dh*3+dw
    s2_ref, b2_ref,            # (Cmid, 1)    f32   folded BN2
    masks_ref,                 # (4, HW)      f32   rows: [w>0, w<W-1, h>0, h<H-1]
    wserT_ref, bser_ref,       # (Crd, Cmid), (Crd, 1)  f32  SE reduce
    wseeT_ref, bsee_ref,       # (Cmid, Crd), (Cmid, 1) f32  SE expand
    wpwlT_ref,                 # (Cout, Cmid) bf16  1x1 project weight^T
    s3_ref, b3_ref,            # (Cout, 1)    f32   folded BN3
    out_ref,                   # (Cout, HW)   f32
    *, W, roll_sign,
):
    f32 = jnp.float32
    HW = xT_ref.shape[1]

    x_f32 = xT_ref[...]                                           # (Cin, HW), kept for residual

    # --- 1x1 pointwise expansion (MXU, bf16 operands / f32 acc) + BN1 + ReLU --
    y = jnp.dot(wpwT_ref[...], x_f32.astype(wpwT_ref.dtype),
                preferred_element_type=f32)                       # (Cmid, HW)
    y = jnp.maximum(y * s1_ref[...] + b1_ref[...], 0.0)

    # --- 3x3 depthwise conv, stride 1, SAME -----------------------------------
    # lshift(a, off)[:, s] == a[:, s + off] (circular); wrapped lanes are killed
    # by the precomputed edge masks.
    def lshift(a, off):
        return pltpu.roll(a, (-off * roll_sign) % HW, 1)

    m = masks_ref[...]
    w_lo, w_hi, h_lo, h_hi = m[0:1], m[1:2], m[2:3], m[3:4]       # each (1, HW)

    wdw = wdw_ref[...]                                            # (Cmid, 9)
    yw0 = w_lo * lshift(y, -1)     # dw=0 taps (source column w-1), w-masked once
    yw1 = y                        # dw=1
    yw2 = w_hi * lshift(y, +1)     # dw=2 taps (source column w+1), w-masked once

    row_m = (lshift(yw0, -W) * wdw[:, 0:1] + lshift(yw1, -W) * wdw[:, 1:2]
             + lshift(yw2, -W) * wdw[:, 2:3])                     # dh=0 (source row h-1)
    row_0 = yw0 * wdw[:, 3:4] + yw1 * wdw[:, 4:5] + yw2 * wdw[:, 5:6]
    row_p = (lshift(yw0, +W) * wdw[:, 6:7] + lshift(yw1, +W) * wdw[:, 7:8]
             + lshift(yw2, +W) * wdw[:, 8:9])                     # dh=2 (source row h+1)
    acc = h_lo * row_m + row_0 + h_hi * row_p

    # folded BN2 + ReLU
    acc = jnp.maximum(acc * s2_ref[...] + b2_ref[...], 0.0)

    # --- squeeze-excite: whole block is one image -> plain lane mean ----------
    x_se = jnp.sum(acc, axis=1, keepdims=True) * (1.0 / HW)       # (Cmid, 1)
    x_se = jnp.dot(wserT_ref[...], x_se, preferred_element_type=f32) + bser_ref[...]
    x_se = jnp.maximum(x_se, 0.0)                                 # (Crd, 1)
    x_se = jnp.dot(wseeT_ref[...], x_se, preferred_element_type=f32) + bsee_ref[...]
    acc = acc * jax.nn.sigmoid(x_se)                              # gate broadcast

    # --- 1x1 pointwise-linear projection (MXU) + BN3 + f32 residual -----------
    z = jnp.dot(wpwlT_ref[...], acc.astype(wpwlT_ref.dtype),
                preferred_element_type=f32)                       # (Cout, HW)
    out_ref[...] = z * s3_ref[...] + b3_ref[...] + x_f32          # residual: Cin==Cout, stride 1


# -----------------------------------------------------------------------------
# Wrapper
# -----------------------------------------------------------------------------
def inverted_residual(x_nchw, params, *, matmul_dtype=jnp.bfloat16):
    """EfficientNet InvertedResidual forward (inference, folded BN).

    x_nchw: (N, Cin, H, W) float32  ->  (N, Cout, H, W) float32.
    The two 1x1 convolutions run with `matmul_dtype` operands on the MXU
    (f32 accumulation); the residual is always added in f32.
    """
    N, Cin, H, W = x_nchw.shape
    (wpw, s1, b1, wdw, s2, b2, wser, bser, wsee, bsee, wpwl, s3, b3) = params
    Cmid = wpw.shape[1]
    Cout = wpwl.shape[1]
    HW = H * W
    assert Cin == Cout, "residual path requires in_chs == out_chs (stride == 1)"
    assert Cin % 8 == 0 and HW % 128 == 0, "lane/sublane tiling needs Cin%8==0, H*W%128==0"
    # TODO(synk): stride>1 / noskip / MixedConv2d / channel-shuffle variants are not
    # implemented (stride-1 MBConv+SE, eval mode, drop_connect inactive). For real
    # EfficientNet feature maps, additionally tile HW inside an image (whole-row tiles
    # with a +/-W-lane halo for the dw conv) and set CompilerParams(vmem_limit_bytes=...)
    # so the per-step working set stays under v7x's 64 MiB VMEM.

    f32 = jnp.float32
    # Channels-on-sublanes / (batch*spatial)-on-lanes layout (NCHW is already
    # channel-major, so this is a cheap wrapper-side transpose).  Kept in f32 so the
    # kernel can add the exact f32 residual; the bf16 cast happens in-register.
    xT = jnp.transpose(x_nchw, (1, 0, 2, 3)).reshape(Cin, N * HW).astype(f32)

    # Host-precomputed image-edge masks (avoids in-kernel iota / integer div-mod,
    # which is expensive for non-power-of-two W).
    wpos = jnp.arange(HW, dtype=jnp.int32) % W
    hpos = jnp.arange(HW, dtype=jnp.int32) // W
    masks = jnp.stack([wpos > 0, wpos < W - 1, hpos > 0, hpos < H - 1]).astype(f32)  # (4, HW)

    col = lambda v: jnp.asarray(v, f32).reshape(-1, 1)
    ins = (
        xT,                                                  # (Cin, N*HW) f32
        jnp.transpose(wpw).astype(matmul_dtype),             # (Cmid, Cin)
        col(s1), col(b1),
        jnp.transpose(wdw.reshape(9, Cmid)).astype(f32),     # (Cmid, 9), col k = dh*3+dw
        col(s2), col(b2),
        masks,                                               # (4, HW)
        jnp.transpose(wser).astype(f32), col(bser),          # (Crd, Cmid), (Crd, 1)
        jnp.transpose(wsee).astype(f32), col(bsee),          # (Cmid, Crd), (Cmid, 1)
        jnp.transpose(wpwl).astype(matmul_dtype),            # (Cout, Cmid)
        col(s3), col(b3),
    )

    kernel = functools.partial(
        inverted_residual_kernel, W=W, roll_sign=_lane_roll_sign())

    def rep_spec(shape):   # replicated (same block every grid step -> DMA'd once)
        nd = len(shape)
        return pl.BlockSpec(shape, lambda n, nd=nd: (0,) * nd)

    in_specs = [
        pl.BlockSpec((Cin, HW), lambda n: (0, n)),           # per-image input slice
        rep_spec(ins[1].shape), rep_spec(ins[2].shape), rep_spec(ins[3].shape),
        rep_spec(ins[4].shape), rep_spec(ins[5].shape), rep_spec(ins[6].shape),
        rep_spec(ins[7].shape),
        rep_spec(ins[8].shape), rep_spec(ins[9].shape),
        rep_spec(ins[10].shape), rep_spec(ins[11].shape),
        rep_spec(ins[12].shape), rep_spec(ins[13].shape), rep_spec(ins[14].shape),
    ]

    outT = pl.pallas_call(
        kernel,
        out_shape=jax.ShapeDtypeStruct((Cout, N * HW), f32),
        grid=(N,),                                           # one independent image per step
        in_specs=in_specs,
        out_specs=pl.BlockSpec((Cout, HW), lambda n: (0, n)),
        compiler_params=pltpu.CompilerParams(dimension_semantics=("parallel",)),
    )(*ins)

    # (Cout, N*H*W) -> (N, Cout, H, W)
    return jnp.transpose(outT.reshape(Cout, N, H, W), (1, 0, 2, 3))


# -----------------------------------------------------------------------------
# Plain-JAX reference for verification
# -----------------------------------------------------------------------------
def ref_forward(x_nchw, params, matmul_dtype=None):
    """Reference using lax.conv.  If matmul_dtype is given, the 1x1-conv operands are
    cast the same way the kernel casts them (f32 accumulation, f32 residual)."""
    (wpw, s1, b1, wdw, s2, b2, wser, bser, wsee, bsee, wpwl, s3, b3) = params
    f32 = jnp.float32
    md = matmul_dtype or f32
    x_f32 = jnp.transpose(x_nchw, (0, 2, 3, 1)).astype(f32)   # NHWC
    dn = ('NHWC', 'HWIO', 'NHWC')
    Cmid = wpw.shape[1]

    y = lax.conv_general_dilated(x_f32.astype(md), wpw.astype(md).reshape(1, 1, *wpw.shape),
                                 (1, 1), 'SAME', dimension_numbers=dn,
                                 preferred_element_type=f32)
    y = jnp.maximum(y * s1 + b1, 0.0)
    yd = lax.conv_general_dilated(y, wdw[:, :, None, :], (1, 1), 'SAME',
                                  dimension_numbers=dn, feature_group_count=Cmid,
                                  preferred_element_type=f32)
    yd = jnp.maximum(yd * s2 + b2, 0.0)
    se = jnp.mean(yd, axis=(1, 2))
    se = jnp.maximum(se @ wser + bser, 0.0)
    se = jax.nn.sigmoid(se @ wsee + bsee)
    yd = yd * se[:, None, None, :]
    z = lax.conv_general_dilated(yd.astype(md), wpwl.astype(md).reshape(1, 1, *wpwl.shape),
                                 (1, 1), 'SAME', dimension_numbers=dn,
                                 preferred_element_type=f32)
    z = z * s3 + b3 + x_f32
    return jnp.transpose(z, (0, 3, 1, 2))


if __name__ == "__main__":
    # Module config: in_chs=out_chs=8, exp_ratio=4 -> mid=32, dw_kernel=3, stride=1,
    # se_ratio=0.25 -> reduce_chs=max(1, int(8*0.25))=2, residual on, eval mode
    # (BN folded to scale/bias, drop_connect inactive).
    N, Cin, H, W = 2, 8, 16, 16
    exp_ratio = 4
    Cmid = Cin * exp_ratio
    Cout = Cin
    Crd = max(1, int(Cin * 0.25))
    eps = 1e-5

    key = jax.random.PRNGKey(0)
    ks = jax.random.split(key, 24)

    x = jax.random.normal(ks[0], (N, Cin, H, W), jnp.float32)

    def bn_fold(kg, kb, km, kv, C):
        gamma = 1.0 + 0.1 * jax.random.normal(kg, (C,), jnp.float32)
        beta = 0.1 * jax.random.normal(kb, (C,), jnp.float32)
        mean = 0.1 * jax.random.normal(km, (C,), jnp.float32)
        var = 1.0 + 0.1 * jnp.abs(jax.random.normal(kv, (C,), jnp.float32))
        s = gamma / jnp.sqrt(var + eps)
        b = beta - mean * s
        return s.reshape(1, C), b.reshape(1, C)

    wpw = jax.random.normal(ks[1], (Cin, Cmid), jnp.float32) / math.sqrt(Cin)
    s1, b1 = bn_fold(ks[2], ks[3], ks[4], ks[5], Cmid)
    wdw = jax.random.normal(ks[6], (3, 3, Cmid), jnp.float32) / 3.0
    s2, b2 = bn_fold(ks[7], ks[8], ks[9], ks[10], Cmid)
    wser = jax.random.normal(ks[11], (Cmid, Crd), jnp.float32) / math.sqrt(Cmid)
    bser = 0.1 * jax.random.normal(ks[12], (1, Crd), jnp.float32)
    wsee = jax.random.normal(ks[13], (Crd, Cmid), jnp.float32) / math.sqrt(Crd)
    bsee = 0.1 * jax.random.normal(ks[14], (1, Cmid), jnp.float32)
    wpwl = jax.random.normal(ks[15], (Cmid, Cout), jnp.float32) / math.sqrt(Cmid)
    s3, b3 = bn_fold(ks[16], ks[17], ks[18], ks[19], Cout)

    params = (wpw, s1, b1, wdw, s2, b2, wser, bser, wsee, bsee, wpwl, s3, b3)

    out = jax.block_until_ready(inverted_residual(x, params))

    # Reference matched to the kernel's bf16 MXU operands (tight tolerance) ...
    ref_bf16 = jax.block_until_ready(ref_forward(x, params, matmul_dtype=jnp.bfloat16))
    # ... and the exact-f32 module semantics (looser tolerance covers bf16 rounding).
    ref_f32 = jax.block_until_ready(ref_forward(x, params))

    assert out.shape == (N, Cout, H, W), out.shape
    assert bool(jnp.all(jnp.isfinite(out)))
    err_matched = float(jnp.max(jnp.abs(out - ref_bf16)))
    err_f32 = float(jnp.max(jnp.abs(out - ref_f32)))
    assert bool(jnp.allclose(out, ref_bf16, rtol=2e-3, atol=2e-3)), err_matched
    assert bool(jnp.allclose(out, ref_f32, rtol=2e-2, atol=2e-2)), err_f32

    print("KERNEL_OK")
</pallas_src>

<mosaic_0001>
module attributes {stable_mosaic.version = 11 : i64} {
  func.func @_probe(%arg0: memref<8x128xf32, #tpu.memory_space<vmem>>, %arg1: memref<8x128xf32, #tpu.memory_space<vmem>>) attributes {dimension_semantics = [], scalar_prefetch = 0 : i64, scratch_operands = 0 : i64, tpu.core_type = #tpu.core_type<tc>} {
    %c0 = arith.constant 0 : index
    %c0_0 = arith.constant 0 : index
    %0 = vector.load %arg0[%c0, %c0_0] : memref<8x128xf32, #tpu.memory_space<vmem>>, vector<8x128xf32>
    %c1_i32 = arith.constant 1 : i32
    %1 = tpu.dynamic_rotate %0 by %c1_i32 dim 1 : vector<8x128xf32>, i32 -> vector<8x128xf32>
    %c0_1 = arith.constant 0 : index
    %c0_2 = arith.constant 0 : index
    %2 = vector.load %arg1[%c0_1, %c0_2] : memref<8x128xf32, #tpu.memory_space<vmem>>, vector<8x128xf32>
    tpu.vector_store %arg1[%c0_1, %c0_2], %1 {strides = array<i32>} : memref<8x128xf32, #tpu.memory_space<vmem>>, vector<8x128xf32>,
    return
  }
}

</mosaic_0001>

<bundles_post_ra>
// kernel: tpu_custom_call.1
= control target key start
LH: loop header
LB: loop body
LE: loop exit
PB: predicated region body
PF: predicated region fallthrough
CT: control target
= control target key end

     0   :  { %6 = vsyncpa [#allocation3], 0  ;;  %s106_s0 = inlined_call_operand.hbm [shape: f32[8,128], index: 0, kind: input, shape index: {}]   ;;  %s107_s1 = inlined_call_operand.hbm [shape: f32[8,128], index: 1, kind: output, shape index: {}]  }
   0x1   :  { %7 = vsyncpa [#allocation4], 0  ;;  %s87_s6 = smov [#allocation2]  }
   0x2   :  { %s14_s7 = sshll.u32 %s87_s6, 4  ;;  %s15_s7 = int_to_ptr.vmem [resolvable:$true] %s14_s7 }
   0x3   :  { %s51_s8 = scalar_lea.vmem %s15_s7, 128  ;;  %p56_p1 = scmp.lt.s32.totalorder %s15_s7, %s15_s7 }
   0x4   :  { %p52_p0 = scmp.ne.s32.totalorder %s15_s7, %s51_s8  ;;  %p57_p2 = scmp.lt.s32.totalorder %s51_s8, %s51_s8 }
   0x6   :  { %p58_p3 = por %p57_p2, %p56_p1 }
   0x8   :  { %p59_p4 = pnand %p58_p3, %p52_p0 }
   0xa   :  { %62 = shalt.err (!%p59_p4)
}
   0xb   :  { %17 = dma.hbm_to_vmem [thread:$0]  %s106_s0, 128, %s15_s7, [#allocation3]  }
   0xc   :  { %83 = dma.done.wait [#allocation3], 128  }
   0xd   :  { %84 = vsyncadd [#allocation3], 4294967168  ;;  %v21_v0 = vld [vmem:[#allocation2] sm:$0xff]  ;;  %s88_s11 = smov 1   ;;  %s89_s12 = smov [#allocation5]  }
   0xe   :  { %22 = vrot.lane.b32.xlu0 %v21_v0, %s88_s11  ;;  %s31_s13 = sshll.u32 %s89_s12, 4  ;;  %s32_s13 = int_to_ptr.vmem [resolvable:$true] %s31_s13 }
   0xf   :  { %s63_s14 = scalar_lea.vmem %s32_s13, 128  ;;  %p68_p6 = scmp.lt.s32.totalorder %s32_s13, %s32_s13 }
  0x10   :  { %p64_p5 = scmp.ne.s32.totalorder %s32_s13, %s63_s14  ;;  %p69_p7 = scmp.lt.s32.totalorder %s63_s14, %s63_s14 }
  0x12   :  { %p70_p8 = por %p69_p7, %p68_p6 }
  0x14   :  { %p71_p9 = pnand %p70_p8, %p64_p5 }
  0x80   :  { %v23_v1 = vpop.permute.xlu0 %22 }
  0x81   :  { %24 = vst [vmem:[#allocation5] sm:$0xff] %v23_v1 }
  0x82   :  { %74 = shalt.err (!%p71_p9)
}
  0x83   :  { %34 = dma.vmem_to_hbm [thread:$0]  %s32_s13, 128, %s107_s1, [#allocation4]  }
  0x84   :  { %85 = dma.done.wait [#allocation4], 128  }
  0x85   :  { %86 = vsyncadd [#allocation4], 4294967168 }
  0x86   :  { %38 = vsyncpa [#allocation3], 1 }
  0x87   :  { %39 = vsyncpa [#allocation4], 1 }

</bundles_post_ra>
